<compile_context>
chip_gen: v7x
topology: tpu7x:2x2x1
jax: 0.10.0
libtpu: 0.0.40
codegen_flags: <defaults>
</compile_context>

<pallas_src>
import functools

import jax
import jax.numpy as jnp
from jax import lax
from jax.experimental import pallas as pl
from jax.experimental.pallas import tpu as pltpu

LANES = 128
_EPS = 1e-10


def _accumulate_tile(pred_ref, targ_ref, out_ref, *, tile_r, sub_r, masked,
                     row_start, valid_rows):
    """Accumulate sum(p*t), sum(t), sum(p) of the current (1, tile_r, 128)
    block into the resident (1, 3, 8, 128) output block, streaming sub_r-row
    chunks through (8, 128) register accumulators."""
    nsub = tile_r // sub_r
    groups = sub_r // 8

    def body(i, carry):
        tp, st, sp = carry
        off = i * sub_r
        if not isinstance(off, int):
            off = pl.multiple_of(off, sub_r)
        p = pred_ref[0, pl.ds(off, sub_r), :].astype(jnp.float32)
        t = targ_ref[0, pl.ds(off, sub_r), :].astype(jnp.float32)
        if masked:
            # Only the ragged final block takes this path (gated by pl.when in
            # the kernel).  Pallas does not zero-fill out-of-range rows, so
            # mask BOTH operands before they meet a multiply.
            rows = row_start + off + lax.broadcasted_iota(
                jnp.int32, (sub_r, LANES), 0)
            ok = rows < valid_rows
            p = jnp.where(ok, p, 0.0)
            t = jnp.where(ok, t, 0.0)
        p3 = p.reshape(groups, 8, LANES)
        t3 = t.reshape(groups, 8, LANES)
        tp = tp + jnp.sum(p3 * t3, axis=0)
        st = st + jnp.sum(t3, axis=0)
        sp = sp + jnp.sum(p3, axis=0)
        return tp, st, sp

    init = (out_ref[0, 0, :, :], out_ref[0, 1, :, :], out_ref[0, 2, :, :])
    if nsub == 1:
        tp, st, sp = body(0, init)
    else:
        tp, st, sp = lax.fori_loop(0, nsub, body, init)
    out_ref[0, 0, :, :] = tp
    out_ref[0, 1, :, :] = st
    out_ref[0, 2, :, :] = sp


def _floss_kernel(pred_ref, targ_ref, out_ref, *, tile_r, sub_r, total_rows):
    k = pl.program_id(1)
    last = pl.num_programs(1) - 1

    @pl.when(k == 0)
    def _init():
        out_ref[...] = jnp.zeros_like(out_ref)

    acc = functools.partial(_accumulate_tile, pred_ref, targ_ref, out_ref,
                            tile_r=tile_r, sub_r=sub_r,
                            row_start=k * tile_r, valid_rows=total_rows)

    if total_rows % tile_r != 0:
        # Ragged tail exists: keep steady-state steps free of mask math and
        # pay for iota/compare/select only on the final reduction step.
        @pl.when(k < last)
        def _steady():
            acc(masked=False)

        @pl.when(k == last)
        def _tail():
            acc(masked=True)
    else:
        acc(masked=False)


def floss(prediction, target, *, beta=0.3, log_like=False,
          block_bytes=8 * 1024 * 1024):
    """Pallas implementation of FLoss.forward.  Batch-leading input of any
    shape; returns a scalar float32."""
    n = prediction.shape[0]
    pred2 = prediction.reshape(n, -1)
    targ2 = target.reshape(n, -1)
    d = pred2.shape[1]

    isz_p = jnp.dtype(prediction.dtype).itemsize
    isz_t = jnp.dtype(target.dtype).itemsize
    row_align = 8 * max(1, 4 // min(isz_p, isz_t))   # 8 f32, 16 bf16, 32 int8

    # Rare ragged fallback: pad D to a multiple of row_align*128 so all
    # reshapes below are copy-free and in-kernel row groups are sublane
    # aligned.  Typical image-shaped inputs take the copy-free path; zero
    # padding does not change any of the three sums.
    pad_unit = row_align * LANES
    if d % pad_unit != 0:
        d_pad = pl.cdiv(d, pad_unit) * pad_unit
        pred2 = jnp.pad(pred2, ((0, 0), (0, d_pad - d)))
        targ2 = jnp.pad(targ2, ((0, 0), (0, d_pad - d)))
        d = d_pad
    r = d // LANES

    # Free 2-way split of the reduction rows for small/odd batch: doubles the
    # number of independent "parallel"-axis programs so v7x's second
    # TensorCore stays busy; harmless on single-TC chips.
    splits = 1
    if n < 8 and r >= 2 * row_align and r % (2 * row_align) == 0:
        splits = 2
    nb = n * splits
    r_split = r // splits

    pred3 = pred2.reshape(nb, r_split, LANES)   # free, row-major compatible
    targ3 = targ2.reshape(nb, r_split, LANES)

    # ---- generation-aware tile sizing ------------------------------------
    SUB = 512                                   # inner accumulation chunk rows
    bytes_per_row = LANES * (isz_p + isz_t)
    try:
        vmem_cap = int(pltpu.get_tpu_info().vmem_capacity_bytes)
    except Exception:                           # pragma: no cover
        vmem_cap = 64 * 1024 * 1024             # conservative (v7x per-TC)
    budget = min(56 * 1024 * 1024, (3 * vmem_cap) // 4)
    headroom = 8 * 1024 * 1024                  # out block, temps, slack
    max_rows_by_vmem = max(row_align, (budget - headroom) // (2 * bytes_per_row))

    tile_r = min(block_bytes // (LANES * isz_p), max_rows_by_vmem)
    if tile_r >= r_split:
        tile_r = r_split                        # whole (split-)sample per step
    else:
        tile_r = max(SUB, (tile_r // SUB) * SUB)
        tile_r = min(tile_r, r_split)

    sub_r = row_align
    for cand in (512, 256, 128, 64, 32, 16, 8):
        if cand >= row_align and tile_r % cand == 0:
            sub_r = cand
            break
    steps = pl.cdiv(r_split, tile_r)

    # 2 inputs x 2 pipeline buffers x tile, plus headroom; stays under the
    # generation-aware budget (<= 3/4 of VMEM, <= 56 MiB).
    vmem_limit = int(min(budget, 2 * tile_r * bytes_per_row + headroom))
    vmem_limit = max(vmem_limit, 16 * 1024 * 1024)

    kernel = functools.partial(_floss_kernel, tile_r=tile_r, sub_r=sub_r,
                               total_rows=r_split)

    partials = pl.pallas_call(
        kernel,
        out_shape=jax.ShapeDtypeStruct((nb, 3, 8, LANES), jnp.float32),
        grid_spec=pltpu.PrefetchScalarGridSpec(
            num_scalar_prefetch=0,
            grid=(nb, steps),
            in_specs=[
                pl.BlockSpec((1, tile_r, LANES), lambda b, k: (b, k, 0)),
                pl.BlockSpec((1, tile_r, LANES), lambda b, k: (b, k, 0)),
            ],
            # Lane-dense output block doubles as the accumulator, resident
            # across the reduction axis.
            out_specs=pl.BlockSpec((1, 3, 8, LANES), lambda b, k: (b, 0, 0, 0)),
        ),
        compiler_params=pltpu.CompilerParams(
            dimension_semantics=("parallel", "arbitrary"),
            vmem_limit_bytes=vmem_limit),
    )(pred3, targ3)

    # Tiny final combine in JAX: cross-sublane/lane reduce, fm, mean.
    sums = jnp.sum(partials, axis=(2, 3))                  # (nb, 3)
    sums = jnp.sum(sums.reshape(n, splits, 3), axis=1)     # (n, 3)
    tp, st, sp = sums[:, 0], sums[:, 1], sums[:, 2]
    h = beta * st + sp
    fm = (1.0 + beta) * tp / (h + _EPS)
    per_sample = -jnp.log(fm) if log_like else 1.0 - fm
    return jnp.mean(per_sample)


def _floss_ref(prediction, target, *, beta=0.3, log_like=False):
    n = prediction.shape[0]
    p = prediction.reshape(n, -1).astype(jnp.float32)
    t = target.reshape(n, -1).astype(jnp.float32)
    tp = jnp.sum(p * t, axis=1)
    h = beta * jnp.sum(t, axis=1) + jnp.sum(p, axis=1)
    fm = (1.0 + beta) * tp / (h + _EPS)
    loss = -jnp.log(fm) if log_like else 1.0 - fm
    return jnp.mean(loss)


if __name__ == "__main__":
    key = jax.random.PRNGKey(0)
    k1, k2, k3, k4 = jax.random.split(key, 4)

    # Main case: NCHW probabilities vs binary mask.
    N, C, H, W = 2, 4, 16, 16
    prediction = jax.nn.sigmoid(jax.random.normal(k1, (N, C, H, W), jnp.float32))
    target = (jax.random.uniform(k2, (N, C, H, W)) > 0.5).astype(jnp.float32)

    out = floss(prediction, target, beta=0.3, log_like=False)
    out = jax.block_until_ready(out)
    ref = _floss_ref(prediction, target, beta=0.3, log_like=False)
    assert jnp.allclose(out, ref, rtol=1e-5, atol=1e-6), (out, ref)

    # Secondary case exercising the ragged-D padding path and the 2-way
    # row split (D = 1200 -> padded to 2048, r = 16, splits = 2).
    pred_b = jax.nn.sigmoid(jax.random.normal(k3, (2, 3, 20, 20), jnp.float32))
    targ_b = (jax.random.uniform(k4, (2, 3, 20, 20)) > 0.5).astype(jnp.float32)
    out_b = jax.block_until_ready(floss(pred_b, targ_b, beta=0.3))
    ref_b = _floss_ref(pred_b, targ_b, beta=0.3)
    assert jnp.allclose(out_b, ref_b, rtol=1e-5, atol=1e-6), (out_b, ref_b)

    print("KERNEL_OK")
</pallas_src>

<mosaic_0001>
module attributes {stable_mosaic.version = 11 : i64} {
  func.func @_floss_kernel(%arg0: i32, %arg1: i32, %arg2: memref<1x8x128xf32, #tpu.memory_space<vmem>>, %arg3: memref<1x8x128xf32, #tpu.memory_space<vmem>>, %arg4: memref<1x3x8x128xf32, #tpu.memory_space<vmem>>) attributes {dimension_semantics = [#tpu.dimension_semantics<parallel>, #tpu.dimension_semantics<arbitrary>], iteration_bounds = array<i64: 2, 1>, scalar_prefetch = 0 : i64, scratch_operands = 0 : i64, tpu.core_type = #tpu.core_type<tc>, window_params = [{transform_indices = @transform_0, window_bounds = array<i64: 1, 8, 128>}, {transform_indices = @transform_1, window_bounds = array<i64: 1, 8, 128>}, {transform_indices = @transform_2, window_bounds = array<i64: 1, 3, 8, 128>}]} {
    %c0_i32 = arith.constant 0 : i32
    %0 = arith.cmpi eq, %arg1, %c0_i32 : i32
    %1 = arith.extui %0 : i1 to i32
    %c0_i32_0 = arith.constant 0 : i32
    %2 = arith.cmpi ne, %1, %c0_i32_0 : i32
    scf.if %2 {
      %cst_30 = arith.constant 0.000000e+00 : f32
      %31 = vector.broadcast %cst_30 : f32 to vector<1x3x8x128xf32>
      %c0_31 = arith.constant 0 : index
      %c0_32 = arith.constant 0 : index
      %c0_33 = arith.constant 0 : index
      %c0_34 = arith.constant 0 : index
      %32 = vector.load %arg4[%c0_31, %c0_32, %c0_33, %c0_34] : memref<1x3x8x128xf32, #tpu.memory_space<vmem>>, vector<1x3x8x128xf32>
      tpu.vector_store %arg4[%c0_31, %c0_32, %c0_33, %c0_34], %31 {strides = array<i32>} : memref<1x3x8x128xf32, #tpu.memory_space<vmem>>, vector<1x3x8x128xf32>,
    } else {
    }
    %c0 = arith.constant 0 : index
    %c0_1 = arith.constant 0 : index
    %c0_2 = arith.constant 0 : index
    %c0_3 = arith.constant 0 : index
    %3 = vector.load %arg4[%c0, %c0_1, %c0_2, %c0_3] : memref<1x3x8x128xf32, #tpu.memory_space<vmem>>, vector<1x1x8x128xf32>
    %4 = vector.shape_cast %3 : vector<1x1x8x128xf32> to vector<8x128xf32>
    %c0_4 = arith.constant 0 : index
    %c1 = arith.constant 1 : index
    %c0_5 = arith.constant 0 : index
    %c0_6 = arith.constant 0 : index
    %5 = vector.load %arg4[%c0_4, %c1, %c0_5, %c0_6] : memref<1x3x8x128xf32, #tpu.memory_space<vmem>>, vector<1x1x8x128xf32>
    %6 = vector.shape_cast %5 : vector<1x1x8x128xf32> to vector<8x128xf32>
    %c0_7 = arith.constant 0 : index
    %c2 = arith.constant 2 : index
    %c0_8 = arith.constant 0 : index
    %c0_9 = arith.constant 0 : index
    %7 = vector.load %arg4[%c0_7, %c2, %c0_8, %c0_9] : memref<1x3x8x128xf32, #tpu.memory_space<vmem>>, vector<1x1x8x128xf32>
    %8 = vector.shape_cast %7 : vector<1x1x8x128xf32> to vector<8x128xf32>
    %c0_10 = arith.constant 0 : index
    %c0_11 = arith.constant 0 : index
    %c0_12 = arith.constant 0 : index
    %9 = vector.load %arg2[%c0_10, %c0_11, %c0_12] : memref<1x8x128xf32, #tpu.memory_space<vmem>>, vector<1x8x128xf32>
    %10 = vector.shape_cast %9 : vector<1x8x128xf32> to vector<8x128xf32>
    %c0_13 = arith.constant 0 : index
    %c0_14 = arith.constant 0 : index
    %c0_15 = arith.constant 0 : index
    %11 = vector.load %arg3[%c0_13, %c0_14, %c0_15] : memref<1x8x128xf32, #tpu.memory_space<vmem>>, vector<1x8x128xf32>
    %12 = vector.shape_cast %11 : vector<1x8x128xf32> to vector<8x128xf32>
    %13 = vector.shape_cast %10 : vector<8x128xf32> to vector<1x8x128xf32>
    %14 = vector.shape_cast %12 : vector<8x128xf32> to vector<1x8x128xf32>
    %15 = arith.mulf %13, %14 : vector<1x8x128xf32>
    %cst = arith.constant dense<0.000000e+00> : vector<8x128xf32>
    %16 = vector.multi_reduction <add>, %15, %cst [0] : vector<1x8x128xf32> to vector<8x128xf32>
    %17 = arith.addf %4, %16 : vector<8x128xf32>
    %cst_16 = arith.constant dense<0.000000e+00> : vector<8x128xf32>
    %18 = vector.multi_reduction <add>, %14, %cst_16 [0] : vector<1x8x128xf32> to vector<8x128xf32>
    %19 = arith.addf %6, %18 : vector<8x128xf32>
    %cst_17 = arith.constant dense<0.000000e+00> : vector<8x128xf32>
    %20 = vector.multi_reduction <add>, %13, %cst_17 [0] : vector<1x8x128xf32> to vector<8x128xf32>
    %21 = arith.addf %8, %20 : vector<8x128xf32>
    %c0_18 = arith.constant 0 : index
    %c0_19 = arith.constant 0 : index
    %c0_20 = arith.constant 0 : index
    %c0_21 = arith.constant 0 : index
    %22 = vector.load %arg4[%c0_18, %c0_19, %c0_20, %c0_21] : memref<1x3x8x128xf32, #tpu.memory_space<vmem>>, vector<1x1x8x128xf32>
    %23 = vector.shape_cast %22 : vector<1x1x8x128xf32> to vector<8x128xf32>
    %24 = vector.shape_cast %17 : vector<8x128xf32> to vector<1x1x8x128xf32>
    tpu.vector_store %arg4[%c0_18, %c0_19, %c0_20, %c0_21], %24 {strides = array<i32>} : memref<1x3x8x128xf32, #tpu.memory_space<vmem>>, vector<1x1x8x128xf32>,
    %c0_22 = arith.constant 0 : index
    %c1_23 = arith.constant 1 : index
    %c0_24 = arith.constant 0 : index
    %c0_25 = arith.constant 0 : index
    %25 = vector.load %arg4[%c0_22, %c1_23, %c0_24, %c0_25] : memref<1x3x8x128xf32, #tpu.memory_space<vmem>>, vector<1x1x8x128xf32>
    %26 = vector.shape_cast %25 : vector<1x1x8x128xf32> to vector<8x128xf32>
    %27 = vector.shape_cast %19 : vector<8x128xf32> to vector<1x1x8x128xf32>
    tpu.vector_store %arg4[%c0_22, %c1_23, %c0_24, %c0_25], %27 {strides = array<i32>} : memref<1x3x8x128xf32, #tpu.memory_space<vmem>>, vector<1x1x8x128xf32>,
    %c0_26 = arith.constant 0 : index
    %c2_27 = arith.constant 2 : index
    %c0_28 = arith.constant 0 : index
    %c0_29 = arith.constant 0 : index
    %28 = vector.load %arg4[%c0_26, %c2_27, %c0_28, %c0_29] : memref<1x3x8x128xf32, #tpu.memory_space<vmem>>, vector<1x1x8x128xf32>
    %29 = vector.shape_cast %28 : vector<1x1x8x128xf32> to vector<8x128xf32>
    %30 = vector.shape_cast %21 : vector<8x128xf32> to vector<1x1x8x128xf32>
    tpu.vector_store %arg4[%c0_26, %c2_27, %c0_28, %c0_29], %30 {strides = array<i32>} : memref<1x3x8x128xf32, #tpu.memory_space<vmem>>, vector<1x1x8x128xf32>,
    return
  }
  func.func @transform_0(%arg0: i32, %arg1: i32) -> (i32, i32, i32) {
    %c0_i32 = arith.constant 0 : i32
    %c0_i32_0 = arith.constant 0 : i32
    return %arg0, %arg1, %c0_i32 : i32, i32, i32
  }
  func.func @transform_1(%arg0: i32, %arg1: i32) -> (i32, i32, i32) {
    %c0_i32 = arith.constant 0 : i32
    %c0_i32_0 = arith.constant 0 : i32
    return %arg0, %arg1, %c0_i32 : i32, i32, i32
  }
  func.func @transform_2(%arg0: i32, %arg1: i32) -> (i32, i32, i32, i32) {
    %c0_i32 = arith.constant 0 : i32
    %c0_i32_0 = arith.constant 0 : i32
    %c0_i32_1 = arith.constant 0 : i32
    %c0_i32_2 = arith.constant 0 : i32
    return %arg0, %c0_i32, %c0_i32_0, %c0_i32_1 : i32, i32, i32, i32
  }
}

</mosaic_0001>

<bundles_post_ra>
// kernel: tpu_custom_call.1
= control target key start
LH: loop header
LB: loop body
LE: loop exit
PB: predicated region body
PF: predicated region fallthrough
CT: control target
= control target key end

     0   :  { %7 = vsyncpa [#allocation3], 0  ;;  %s839_s0 = inlined_call_operand.hbm [shape: f32[2,8,128], index: 0, kind: input, shape index: {}]   ;;  %s840_s1 = inlined_call_operand.hbm [shape: f32[2,8,128], index: 1, kind: input, shape index: {}]   ;;  %s841_s2 = inlined_call_operand.hbm [shape: f32[2,3,8,128], index: 2, kind: output, shape index: {}]  }
   0x1   :  { %9 = vsyncpa [#allocation3 + $0x1], 0 }
   0x2   :  { %10 = vsyncpa [#allocation6], 0 }
   0x3   :  { %12 = vsyncpa [#allocation6 + $0x1], 0 }
   0x4   :  { %13 = vsyncpa [#allocation4], 0 }
   0x5   :  { %15 = vsyncpa [#allocation4 + $0x1], 0  ;;  %s616_s9 = smov 0   ;;  %s618_s10 = smov 0  }
   0x6   :  { %s620_s11 = smov 0   ;;  %s622_s12 = smov 0  }
   0x7   :  { %s624_s13 = smov 0   ;;  %s626_s14 = smov 0  }
   0x8 LB: > { %s358_s15 = sadd.s32 4294967295, %s594_s14   ;;  %s359_s16 = sadd.s32 4294967294, %s594_s14   ;;  %s594_s14 = sphi %s626_s14, %s21_s14   ;;  %s590_s13 = sphi %s624_s13, %s861_s13   ;;  %s586_s12 = sphi %s622_s12, %s860_s12   ;;  %s582_s11 = sphi %s620_s11, %s859_s11   ;;  %s578_s10 = sphi %s618_s10, %s858_s10   ;;  %s574_s9 = sphi %s616_s9, %s857_s9  }
   0x9   : > { %s33_s17 = sadd.s32 1, %s590_s13  ;;  %s42_s18 = sadd.s32 1, %s582_s11 }
   0xa   : > { %p35_p0 = scmp.ge.s32.totalorder %s33_s17, 2  ;;  %p49_p1 = scmp.ne.s32.totalorder %s582_s11, %s578_s10 }
   0xb   : > { %p50_p2 = scmp.eq.s32.totalorder %s594_s14, 0  ;;  %p55_p3 = scmp.ne.s32.totalorder %s578_s10, %s574_s9 }
   0xc   : > { %s863_s17 = smov (%p35_p0, %s33_s17), 0  ;;  %p56_p5 = scmp.eq.s32.totalorder %s358_s15, 0 }
   0xd   : > { %p657_p4 = por %p50_p2, %p49_p1  ;;  %s37_s20 = ssub.s32 %s590_s13, %s863_s17 }
   0xe   : > { %p107_p6 = scmp.eq.s32.totalorder %s358_s15, 1  ;;  %p40_p7 = scmp.eq.s32.totalorder %s37_s20, 0 }
   0xf   : > { %p663_p8 = por %p56_p5, %p55_p3  ;;  %p113_p10 = scmp.eq.s32.totalorder %s359_s16, 1 }
  0x10   : > { %p667_p9 = por %p107_p6, %p49_p1  ;;  %p395_p13 = scmp.lt.s32.totalorder %s594_s14, 2 }
  0x11   : > { %s845_s21 = scalar_select %p663_p8, 1, 0 }
  0x12   : > { %s846_s22 = scalar_select %p667_p9, 1, 0 }
  0x13   : > { %s672_s23 = scalar_select %p40_p7, %s582_s11, %s42_s18  }
  0x14   : > { %p674_p11 = por %p113_p10, %p55_p3  ;;  %s681_s25 = sand.u32 1, %s582_s11  }
  0x15   : > { %s362_s26 = sshll.u32 %s681_s25, 3  ;;  %s363_s27 = sshll.u32 %s590_s13, 7 }
  0x16   : > { %s847_s24 = scalar_select %p674_p11, 1, 0 }
  0x17   : > { %s690_s30 = scalar_lea.hbm %s839_s0, %s363_s27  ;;  %s137_s3 = scalar_lea.vmem [#allocation2], %s362_s26 }
  0x18   : > { %s145_s4 = sshll.u32 %s137_s3, 4  ;;  %p698_p0 = pnand %p395_p13, %p657_p4  ;;  %s694_s4 = int_to_ptr.vmem [resolvable:$true] %s145_s4 }
  0x19   : > { %s134_s6 = scalar_lea.sflag [#allocation3], %s681_s25  ;;  %s448_s7 = scalar_lea.hbm %s690_s30, 128 }
  0x1a   : > { %p449_p3 = scmp.ne.s32.totalorder %s690_s30, %s448_s7  ;;  %p450_p5 = pneg %p698_p0 }
  0x1b   : > { %s453_s16 = scalar_lea.hbm %s839_s0, 256  ;;  %p454_p4 = scmp.lt.u32.totalorder %s690_s30, %s839_s0 }
  0x1c   : > { %p451_p6 = pnand %p450_p5, %p449_p3  ;;  %p455_p10 = scmp.lt.u32.totalorder %s453_s16, %s448_s7 }
  0x1d   : > { %p457_p12 = scmp.lt.u32.totalorder %s448_s7, %s690_s30 }
  0x1e   : > { %p452_p7 = pneg %p451_p6  ;;  %p456_p13 = por %p455_p10, %p454_p4 }
  0x20   : > { %p458_p1 = por %p457_p12, %p456_p13 }
  0x22   : > { %p459_p2 = pnand %p458_p1, %p452_p7 }
  0x24   : > { %462 = shalt.err (!%p459_p2)
}
  0x25   : > { %s463_s20 = scalar_lea.vmem %s694_s4, 128  ;;  %s596_s28 = smov [#allocation2]  }
  0x26   : > { %p464_p3 = scmp.ne.s32.totalorder %s694_s4, %s463_s20  ;;  %s468_s29 = sshll.u32 %s596_s28, 4  ;;  %s469_s29 = int_to_ptr.vmem [resolvable:$false] %s468_s29 }
  0x27   : > { %s470_s3 = scalar_lea.vmem %s469_s29, 256  ;;  %p471_p9 = scmp.lt.s32.totalorder %s694_s4, %s469_s29 }
  0x28   : > { %p466_p6 = pnand %p464_p3, %p450_p5  ;;  %p472_p4 = scmp.lt.s32.totalorder %s470_s3, %s463_s20 }
  0x2a   : > { %p467_p11 = pneg %p466_p6  ;;  %p473_p10 = por %p472_p4, %p471_p9 }
  0x2c   : > { %p474_p12 = pnand %p473_p10, %p467_p11 }
  0x2e   : > { %477 = shalt.err (!%p474_p12)
}
  0x2f   : > { %387 = dma.hbm_to_vmem [thread:$0]  (!%p698_p0), %s690_s30, 128, %s694_s4, %s134_s6  }
  0x30   : > { %p849_p1 = scmp.lt.s32.totalorder %s594_s14, 3  ;;  %p850_p2 = scmp.ge.s32.totalorder %s594_s14, 1 }
  0x31   : > { %s743_s16 = scalar_lea.hbm %s840_s1, %s363_s27  ;;  %s156_s18 = scalar_lea.vmem [#allocation5], %s362_s26 }
  0x32   : > { %p734_p7 = pnand %p850_p2, %p849_p1  ;;  %s164_s19 = sshll.u32 %s156_s18, 4  ;;  %s165_s19 = int_to_ptr.vmem [resolvable:$true] %s164_s19 }
  0x33   : > { %s153_s30 = scalar_lea.sflag [#allocation6], %s681_s25  ;;  %s478_s4 = scalar_lea.hbm %s743_s16, 128 }
  0x34   : > { %s851_s7 = scalar_select %p734_p7, 1, 0 }
  0x35   : > { %p479_p9 = scmp.ne.s32.totalorder %s743_s16, %s478_s4  ;;  %s483_s27 = scalar_lea.hbm %s840_s1, 256 }
  0x36   : > { %p484_p3 = scmp.lt.u32.totalorder %s743_s16, %s840_s1  ;;  %p485_p6 = scmp.lt.u32.totalorder %s483_s27, %s478_s4 }
  0x37   : > { %p481_p11 = pnand %p479_p9, %p450_p5  ;;  %p487_p10 = scmp.lt.u32.totalorder %s478_s4, %s743_s16 }
  0x38   : > { %p486_p4 = por %p485_p6, %p484_p3 }
  0x39   : > { %p482_p13 = pneg %p481_p11 }
  0x3a   : > { %p488_p12 = por %p487_p10, %p486_p4 }
  0x3c   : > { %p489_p1 = pnand %p488_p12, %p482_p13 }
  0x3e   : > { %492 = shalt.err (!%p489_p1)
}
  0x3f   : > { %s493_s25 = scalar_lea.vmem %s165_s19, 128  ;;  %s597_s26 = smov [#allocation5]  }
  0x40   : > { %p494_p2 = scmp.ne.s32.totalorder %s165_s19, %s493_s25  ;;  %s498_s3 = sshll.u32 %s597_s26, 4  ;;  %s499_s3 = int_to_ptr.vmem [resolvable:$false] %s498_s3 }
  0x41   : > { %s500_s8 = scalar_lea.vmem %s499_s3, 256  ;;  %p501_p8 = scmp.lt.s32.totalorder %s165_s19, %s499_s3 }
  0x42   : > { %p496_p9 = pnand %p494_p2, %p450_p5  ;;  %p502_p7 = scmp.lt.s32.totalorder %s500_s8, %s493_s25 }
  0x44   : > { %p497_p11 = pneg %p496_p9  ;;  %p503_p3 = por %p502_p7, %p501_p8 }
  0x46   : > { %p504_p6 = pnand %p503_p3, %p497_p11 }
  0x48   : > { %507 = shalt.err (!%p504_p6)
}
  0x49   : > { %390 = dma.hbm_to_vmem [thread:$0]  (!%p698_p0), %s743_s16, 128, %s165_s19, %s153_s30  }
  0x4a   : > { %p852_p13 = scmp.ne.s32.totalorder %s851_s7, 0 }
  0x4b   : > { %s770_s15 = sand.u32 (!%p852_p13), 1, %s578_s10   ;;  %p853_p5 = scmp.ne.s32.totalorder (!%p852_p13), %s845_s21, 0 }
  0x4c   : > { %173 = sbr.rel (%p852_p13) target bundleno = 113 (0x71), region = 28  ;;  %s367_s18 = sshll.u32 (!%p852_p13), %s770_s15, 3 }
  0x4d   : > { %s176_s4 = scalar_lea.sflag (!%p852_p13), [#allocation3], %s770_s15  ;;  %s179_s6 = scalar_lea.vmem (!%p852_p13), [#allocation2], %s367_s18 }
  0x53   : > { %561 = dma.done.wait (%p853_p5), %s176_s4, 128  }
  0x54   : > { %563 = vsyncadd (%p853_p5), %s176_s4, 4294967168  ;;  %s185_s5 = scalar_lea.sflag [#allocation6], %s770_s15  ;;  %s188_s16 = scalar_lea.vmem [#allocation5], %s367_s18 }
  0x55   : > { %565 = dma.done.wait (%p853_p5), %s185_s5, 128  }
  0x56   : > { %567 = vsyncadd (%p853_p5), %s185_s5, 4294967168  ;;  %s376_s7 = smul.u32 24, %s770_s15  ;;  %v226_v0 = vld [vmem:[%s179_s6] sm:$0xff]  ;;  %v227_v1 = vld [vmem:[%s188_s16] sm:$0xff]  ;;  %s239_s21 = scalar_lea.sflag [#allocation4], %s770_s15 }
  0x57   : > { %s377_s19 = smul.u32 384, %s586_s12  ;;  %v228_v2 = vmul.f32 %v227_v1, %v226_v0  ;;  %p854_p0 = scmp.ne.s32.totalorder %s846_s22, 0 }
  0x58   : > { %s213_s30 = scalar_lea.vmem [#allocation7], %s376_s7  ;;  %s598_s25 = smov [#allocation7]  }
  0x59   : > { %s252_s20 = sshll.u32 %s213_s30, 4  ;;  %371 = vst [vmem:[%s213_s30 + $0x8] sm:$0xff] %v227_v1  ;;  %372 = vst [vmem:[%s213_s30 + $0x10] sm:$0xff] %v226_v0  ;;  %s788_s29 = scalar_lea.hbm %s841_s2, %s377_s19  ;;  %s790_s20 = int_to_ptr.vmem [resolvable:$true] %s252_s20 }
  0x5a   : > { %235 = vst [vmem:[%s213_s30] sm:$0xff] %v228_v2  ;;  %s508_s12 = scalar_lea.vmem %s790_s20, 384  ;;  %s512_s26 = sshll.u32 %s598_s25, 4  ;;  %s513_s26 = int_to_ptr.vmem [resolvable:$false] %s512_s26 }
  0x5b   : > { %p509_p8 = scmp.ne.s32.totalorder %s790_s20, %s508_s12  ;;  %s514_s3 = scalar_lea.vmem %s513_s26, 768 }
  0x5c   : > { %p515_p10 = scmp.lt.s32.totalorder %s790_s20, %s513_s26  ;;  %p516_p12 = scmp.lt.s32.totalorder %s514_s3, %s508_s12 }
  0x5d   : > { %p510_p7 = pnand %p509_p8, %p854_p0 }
  0x5e   : > { %p517_p1 = por %p516_p12, %p515_p10 }
  0x5f   : > { %p511_p4 = pneg %p510_p7 }
  0x61   : > { %p518_p2 = pnand %p517_p1, %p511_p4 }
  0x63   : > { %521 = shalt.err (!%p518_p2)
}
  0x64   : > { %s522_s8 = scalar_lea.hbm %s788_s29, 384  ;;  %s526_s6 = scalar_lea.hbm %s841_s2, 768 }
  0x65   : > { %p523_p9 = scmp.ne.s32.totalorder %s788_s29, %s522_s8  ;;  %p527_p6 = scmp.lt.u32.totalorder %s788_s29, %s841_s2 }
  0x66   : > { %p528_p13 = scmp.lt.u32.totalorder %s526_s6, %s522_s8  ;;  %p530_p8 = scmp.lt.u32.totalorder %s522_s8, %s788_s29 }
  0x67   : > { %p524_p11 = pnand %p523_p9, %p854_p0 }
  0x68   : > { %p529_p5 = por %p528_p13, %p527_p6 }
  0x69   : > { %p525_p3 = pneg %p524_p11 }
  0x6a   : > { %p531_p7 = por %p530_p8, %p529_p5 }
  0x6c   : > { %p532_p4 = pnand %p531_p7, %p525_p3 }
  0x6e   : > { %535 = shalt.err (!%p532_p4)
}
  0x6f   : > { %s599_s7 = smov 128   ;;  %s600_s19 = smov 8  }
  0x70   : > { %382 = dma.vmem_to_hbm [thread:$0]  (%p854_p0), %s790_s20, 384, %s788_s29, %s239_s21, %s599_s7, %s599_s7, %s600_s19  }
  0x71 PF: > { %s267_s30 = sand.u32 1, %s574_s9   ;;  %p855_p10 = scmp.ne.s32.totalorder %s847_s24, 0 }
  0x72   : > { %p856_p12 = scmp.ge.s32.totalorder %s594_s14, 2  ;;  %s268_s27 = scalar_lea.sflag [#allocation4], %s267_s30 }
  0x74   : > { %p392_p1 = pnand %p856_p12, %p855_p10 }
  0x76   : > { %569 = dma.done.wait (!%p392_p1), %s268_s27, 384  }
  0x77   : > { %571 = vsyncadd (!%p392_p1), %s268_s27, 4294966912  ;;  %s21_s14 = sadd.s32 1, %s594_s14   ;;  %s857_s9 = smov %s578_s10 }
  0x78   : > { %p18_p2 = scmp.ge.s32.totalorder %s21_s14, 4   ;;  %s858_s10 = smov %s582_s11 }
  0x79   : > { %s859_s11 = smov %s672_s23  ;;  %s860_s12 = smov %s590_s13 }
  0x7a   : > { %s861_s13 = smov %s863_s17  ;;  %20 = sbr.rel (!%p18_p2) target bundleno = 8 (0x8), region = 92 }
  0x81   :  { %273 = vsyncpa [#allocation3], 1 }
  0x82   :  { %275 = vsyncpa [#allocation3 + $0x1], 1 }
  0x83   :  { %276 = vsyncpa [#allocation6], 1 }
  0x84   :  { %278 = vsyncpa [#allocation6 + $0x1], 1 }
  0x85   :  { %279 = vsyncpa [#allocation4], 1 }
  0x86   :  { %281 = vsyncpa [#allocation4 + $0x1], 1 }

</bundles_post_ra>
